<compile_context>
chip_gen: v5e
topology: v5e:2x2
jax: 0.10.0
libtpu: 0.0.40
codegen_flags: <defaults>
</compile_context>

<pallas_src>
import functools
import math

import jax
import jax.numpy as jnp
from jax import lax
from jax.experimental import pallas as pl
from jax.experimental.pallas import tpu as pltpu


def _pe_dropout_kernel(seed_ref, x_ref, pe_ref, o_ref, *,
                       p, train, seq_len, d_model, tile_s):
    # x_ref / pe_ref / o_ref: (1, TILE_S, D) VMEM tiles
    y = x_ref[...] + pe_ref[...]

    if train and p > 0.0:
        s_blk = pl.program_id(0)          # outer axis: S tile
        b = pl.program_id(1)              # inner axis: batch row

        # Global element index -> stateless hash -> keep mask.
        # Independent of tiling / grid order, so masks never repeat across
        # S tiles or batch rows.
        rows = lax.broadcasted_iota(jnp.int32, y.shape, 1)   # local row in tile
        cols = lax.broadcasted_iota(jnp.int32, y.shape, 2)   # feature index
        grow = s_blk * tile_s + rows                         # global seq position
        gidx = (b * seq_len + grow) * d_model + cols

        h = gidx.astype(jnp.uint32)
        h = h + seed_ref[0].astype(jnp.uint32) * jnp.uint32(0x9E3779B9)
        # murmur3 fmix32 finalizer (integer VPU ops only)
        h = h ^ (h >> 16)
        h = h * jnp.uint32(0x85EBCA6B)
        h = h ^ (h >> 13)
        h = h * jnp.uint32(0xC2B2AE35)
        h = h ^ (h >> 16)

        keep_prob = 1.0 - p
        # Compare top 24 bits (non-negative in int32) against an int threshold:
        # no shift-to-float / convert / 1/2^24 multiply needed.
        h24 = (h >> 8).astype(jnp.int32)
        thresh24 = jnp.int32(int(round(keep_prob * (1 << 24))))
        keep = h24 < thresh24
        y = jnp.where(keep, y * (1.0 / keep_prob), jnp.zeros_like(y))

    o_ref[...] = y.astype(o_ref.dtype)


def make_positional_encoding_table(d_model, max_len=5000, dtype=jnp.float32):
    """Deterministic buffer, identical to the torch __init__ (no learned params)."""
    position = jnp.arange(max_len, dtype=jnp.float32)[:, None]            # (max_len, 1)
    div_term = jnp.exp(
        jnp.arange(0, d_model, 2, dtype=jnp.float32) * (-math.log(10000.0) / d_model)
    )                                                                      # (d_model//2,)
    angles = position * div_term                                           # (max_len, d_model//2)
    pe = jnp.zeros((max_len, d_model), dtype)
    pe = pe.at[:, 0::2].set(jnp.sin(angles).astype(dtype))
    pe = pe.at[:, 1::2].set(jnp.cos(angles).astype(dtype))
    return pe[None]                                                        # (1, max_len, d_model)


def _choose_tile_s(S, D, itemsize, budget_bytes=2 << 20):
    """Largest multiple-of-8 row tile with <= ~2 MiB per buffer (or full S)."""
    if S * D * itemsize <= budget_bytes:
        return S
    tile = max(8, (budget_bytes // max(1, D * itemsize)) // 8 * 8)
    return int(min(tile, S))


def positional_encoding_forward(x, pe_table, *, p=0.1, train=False, seed=0):
    """x: (B, S, D); pe_table: (1, max_len, D). Returns dropout(x + pe[:, :S, :])."""
    B, S, D = x.shape
    itemsize = jnp.dtype(x.dtype).itemsize
    pe = pe_table[:, :S, :].astype(x.dtype)       # slice + match activation dtype
    seed_arr = jnp.array([seed], dtype=jnp.int32)

    tile_s = _choose_tile_s(S, D, itemsize)
    num_s = pl.cdiv(S, tile_s)

    kernel = functools.partial(
        _pe_dropout_kernel,
        p=float(p), train=bool(train),
        seq_len=S, d_model=D, tile_s=tile_s,
    )

    cost = pl.CostEstimate(
        flops=B * S * D,
        transcendentals=0,
        bytes_accessed=(2 * B * S * D + S * D) * itemsize,   # x read + out write + pe read
    )

    return pl.pallas_call(
        kernel,
        out_shape=jax.ShapeDtypeStruct((B, S, D), x.dtype),
        grid_spec=pltpu.PrefetchScalarGridSpec(
            num_scalar_prefetch=1,                # seed lands in SMEM
            # S-tile index on the OUTER axis so the pe block is re-fetched only
            # when the S tile changes (not once per batch row).
            grid=(num_s, B),
            in_specs=[
                pl.BlockSpec((1, tile_s, D), lambda s, b, seed: (b, s, 0)),   # x
                pl.BlockSpec((1, tile_s, D), lambda s, b, seed: (0, s, 0)),   # pe (batch-bcast)
            ],
            out_specs=pl.BlockSpec((1, tile_s, D), lambda s, b, seed: (b, s, 0)),
        ),
        compiler_params=pltpu.CompilerParams(
            dimension_semantics=("parallel", "parallel"),   # megacore-shardable on v7x
            vmem_limit_bytes=32 * 1024 * 1024,
        ),
        cost_estimate=cost,
    )(seed_arr, x, pe)


if __name__ == "__main__":
    B, S, D = 2, 8, 32
    MAX_LEN = 64        # small max_len for the example (module default is 5000)
    P_DROP = 0.1

    key = jax.random.PRNGKey(0)
    x = jax.random.normal(key, (B, S, D), dtype=jnp.float32)

    pe_table = make_positional_encoding_table(D, max_len=MAX_LEN)

    # Eval mode (dropout = identity): must match the pure-JAX reference exactly.
    y_eval = positional_encoding_forward(x, pe_table, p=P_DROP, train=False)
    y_eval = jax.block_until_ready(y_eval)
    ref = x + pe_table[:, :S, :]
    assert y_eval.shape == (B, S, D)
    assert jnp.allclose(y_eval, ref, atol=1e-6), "eval-mode mismatch"

    # Train mode: dropout mask generated in-kernel (stateless hash).
    # TODO(synk): cannot bit-match torch's RNG stream; statistics/scaling match nn.Dropout(p).
    y_train = positional_encoding_forward(x, pe_table, p=P_DROP, train=True, seed=0)
    y_train = jax.block_until_ready(y_train)
    assert y_train.shape == (B, S, D)
    # dropped elements are exactly zero; kept elements are ref / (1 - p)
    kept = y_train != 0.0
    assert jnp.allclose(jnp.where(kept, y_train, 0.0),
                        jnp.where(kept, ref / (1.0 - P_DROP), 0.0), atol=1e-5)

    print("KERNEL_OK")
</pallas_src>

<mosaic_0001>
module attributes {stable_mosaic.version = 11 : i64} {
  func.func @_pe_dropout_kernel(%arg0: i32, %arg1: i32, %arg2: memref<1xi32, #tpu.memory_space<smem>>, %arg3: memref<1x8x32xf32, #tpu.memory_space<vmem>>, %arg4: memref<1x8x32xf32, #tpu.memory_space<vmem>>, %arg5: memref<1x8x32xf32, #tpu.memory_space<vmem>>) attributes {dimension_semantics = [#tpu.dimension_semantics<parallel>, #tpu.dimension_semantics<parallel>], iteration_bounds = array<i64: 1, 2>, scalar_prefetch = 1 : i64, scratch_operands = 0 : i64, tpu.core_type = #tpu.core_type<tc>, window_params = [{transform_indices = @transform_0, window_bounds = array<i64: 1, 8, 32>}, {transform_indices = @transform_1, window_bounds = array<i64: 1, 8, 32>}, {transform_indices = @transform_2, window_bounds = array<i64: 1, 8, 32>}]} {
    %c0 = arith.constant 0 : index
    %c0_0 = arith.constant 0 : index
    %c0_1 = arith.constant 0 : index
    %0 = vector.load %arg3[%c0, %c0_0, %c0_1] : memref<1x8x32xf32, #tpu.memory_space<vmem>>, vector<1x8x32xf32>
    %c0_2 = arith.constant 0 : index
    %c0_3 = arith.constant 0 : index
    %c0_4 = arith.constant 0 : index
    %1 = vector.load %arg4[%c0_2, %c0_3, %c0_4] : memref<1x8x32xf32, #tpu.memory_space<vmem>>, vector<1x8x32xf32>
    %2 = arith.addf %0, %1 : vector<1x8x32xf32>
    %c0_5 = arith.constant 0 : index
    %c0_6 = arith.constant 0 : index
    %c0_7 = arith.constant 0 : index
    %3 = vector.load %arg5[%c0_5, %c0_6, %c0_7] : memref<1x8x32xf32, #tpu.memory_space<vmem>>, vector<1x8x32xf32>
    tpu.vector_store %arg5[%c0_5, %c0_6, %c0_7], %2 {strides = array<i32>} : memref<1x8x32xf32, #tpu.memory_space<vmem>>, vector<1x8x32xf32>,
    return
  }
  func.func @transform_0(%arg0: i32, %arg1: i32, %arg2: memref<1xi32, #tpu.memory_space<smem>>) -> (i32, i32, i32) {
    %c0_i32 = arith.constant 0 : i32
    %c0_i32_0 = arith.constant 0 : i32
    return %arg1, %arg0, %c0_i32 : i32, i32, i32
  }
  func.func @transform_1(%arg0: i32, %arg1: i32, %arg2: memref<1xi32, #tpu.memory_space<smem>>) -> (i32, i32, i32) {
    %c0_i32 = arith.constant 0 : i32
    %c0_i32_0 = arith.constant 0 : i32
    %c0_i32_1 = arith.constant 0 : i32
    return %c0_i32, %arg0, %c0_i32_0 : i32, i32, i32
  }
  func.func @transform_2(%arg0: i32, %arg1: i32, %arg2: memref<1xi32, #tpu.memory_space<smem>>) -> (i32, i32, i32) {
    %c0_i32 = arith.constant 0 : i32
    %c0_i32_0 = arith.constant 0 : i32
    return %arg1, %arg0, %c0_i32 : i32, i32, i32
  }
}

</mosaic_0001>

<bundles_post_ra>
// kernel: tpu_custom_call.1
= control target key start
LH: loop header
LB: loop body
LE: loop exit
PB: predicated region body
PF: predicated region fallthrough
CT: control target
= control target key end

     0   :  { %9 = vsyncpa [#allocation5], 0  ;;  %s722_s0 = inlined_call_operand.<no memory space> [shape: s32[1], index: 0, kind: input, shape index: {}]   ;;  %s723_s1 = inlined_call_operand.hbm [shape: f32[2,8,32], index: 1, kind: input, shape index: {}]   ;;  %s724_s2 = inlined_call_operand.hbm [shape: f32[1,8,32], index: 2, kind: input, shape index: {}]   ;;  %s725_s3 = inlined_call_operand.hbm [shape: f32[2,8,32], index: 3, kind: output, shape index: {}]  }
   0x1   :  { %11 = vsyncpa [#allocation5 + $0x1], 0 }
   0x2   :  { %12 = vsyncpa [#allocation8], 0 }
   0x3   :  { %13 = vsyncpa [#allocation6], 0 }
   0x4   :  { %15 = vsyncpa [#allocation6 + $0x1], 0  ;;  %s573_s12 = smov 0   ;;  %s575_s13 = smov 0  }
   0x5   :  { %s577_s14 = smov 0   ;;  %s579_s0 = smov 0  }
   0x6   :  { %s581_s15 = smov 0   ;;  %s583_s16 = smov 0  }
   0x7 LB: > { %s316_s17 = sadd.s32 4294967295, %s550_s16   ;;  %s317_s18 = sadd.s32 4294967294, %s550_s16   ;;  %s550_s16 = sphi %s583_s16, %s21_s16   ;;  %s546_s15 = sphi %s581_s15, %s737_s15   ;;  %s542_s0 = sphi %s579_s0, %s736_s0   ;;  %s538_s14 = sphi %s577_s14, %s735_s14   ;;  %s534_s13 = sphi %s575_s13, %s734_s13   ;;  %s530_s12 = sphi %s573_s12, %s733_s12  }
   0x8   : > { %p55_p0 = scmp.ne.s32.totalorder %s534_s13, %s530_s12  ;;  %p607_p1 = scmp.eq.s32.totalorder %s316_s17, 0 }
   0x9   : > { %p611_p2 = scmp.eq.s32.totalorder %s316_s17, 1  ;;  %p113_p3 = scmp.eq.s32.totalorder %s317_s18, 1 }
   0xa   : > { %p617_p4 = por %p607_p1, %p55_p0  ;;  %p318_p5 = scmp.ge.s32.totalorder %s550_s16, 1 }
   0xb   : > { %p622_p6 = por %p113_p3, %p55_p0  ;;  %p120_p7 = scmp.lt.s32.totalorder %s550_s16, 3 }
   0xc   : > { %s134_s25 = sshll.u32 %s724_s2, 4  ;;  %p320_p9 = scmp.ge.s32.totalorder %s550_s16, 2  ;;  %s135_s25 = int_to_ptr.hbm [resolvable:$true] %s134_s25 }
   0xd   : > { %p630_p8 = pnand %p318_p5, %p120_p7  ;;  %s552_s27 = smov [#allocation7]  }
   0xe   : > { %s136_s28 = sshll.u32 %s552_s27, 4  ;;  %s30_s29 = sadd.s32 1, %s546_s15  ;;  %s137_s28 = int_to_ptr.vmem [resolvable:$true] %s136_s28 }
   0xf   : > { %p339_p10 = pneg %p630_p8  ;;  %p31_p12 = scmp.ge.s32.totalorder %s30_s29, 2 }
  0x10   : > { %s42_s30 = sadd.s32 1, %s538_s14  ;;  %p49_p13 = scmp.ne.s32.totalorder %s538_s14, %s534_s13 }
  0x11   : > { %p340_p11 = pnand %p339_p10, %p607_p1  ;;  %p50_p0 = scmp.eq.s32.totalorder %s550_s16, 0 }
  0x12   : > { %s739_s29 = smov (%p31_p12, %s30_s29), 0  ;;  %p652_p5 = por %p611_p2, %p49_p13 }
  0x13   : > { %342 = dma.hbm_to_vmem [thread:$0]  (!%p340_p11), %s135_s25, 128, %s137_s28, [#allocation8]  }
  0x14   : > { %p646_p3 = por %p50_p0, %p49_p13  ;;  %s37_s6 = ssub.s32 %s546_s15, %s739_s29 }
  0x15   : > { %p352_p7 = scmp.lt.s32.totalorder %s550_s16, 2  ;;  %p40_p10 = scmp.eq.s32.totalorder %s37_s6, 0 }
  0x16   : > { %s147_s7 = sand.u32 1, %s538_s14   ;;  %s322_s10 = sshll.u32 %s546_s15, 3 }
  0x17   : > { %s321_s8 = sshll.u32 %s147_s7, 3  ;;  %s156_s18 = scalar_lea.hbm %s723_s1, %s322_s10 }
  0x18   : > { %s661_s9 = scalar_select %p40_p10, %s538_s14, %s42_s30  }
  0x19   : > { %s151_s23 = scalar_lea.vmem [#allocation4], %s321_s8  ;;  %s158_s20 = sshll.u32 %s156_s18, 4  ;;  %s159_s20 = int_to_ptr.hbm [resolvable:$true] %s158_s20 }
  0x1a   : > { %s160_s24 = sshll.u32 %s151_s23, 4  ;;  %p344_p2 = pnand %p352_p7, %p646_p3  ;;  %s161_s24 = int_to_ptr.vmem [resolvable:$true] %s160_s24 }
  0x1b   : > { %s148_s25 = scalar_lea.sflag [#allocation5], %s147_s7  ;;  %169 = sbr.rel (%p630_p8) target bundleno = 50 (0x32), region = 28 }
  0x1c   : > { %346 = dma.hbm_to_vmem [thread:$0]  (!%p344_p2), %s159_s20, 128, %s161_s24, %s148_s25  }
  0x1d   : > { %s672_s27 = sand.u32 (!%p630_p8), 1, %s534_s13  }
  0x1e   : > { %s324_s28 = sshll.u32 (!%p630_p8), %s672_s27, 3  ;;  %s172_s30 = scalar_lea.sflag (!%p630_p8), [#allocation5], %s672_s27 }
  0x1f   : > { %s175_s6 = scalar_lea.vmem (!%p630_p8), [#allocation4], %s324_s28 }
  0x20   : > { %517 = dma.done.wait (%p617_p4), %s172_s30, 128  }
  0x21   : > { %519 = vsyncadd (%p617_p4), %s172_s30, 4294967168 }
  0x22   : > { %521 = dma.done.wait (%p607_p1), [#allocation8], 128  }
  0x23   : > { %523 = vsyncadd (%p607_p1), [#allocation8], 4294967168  ;;  %s328_s26 = sshll.u32 %s542_s0, 3  ;;  %s201_s10 = scalar_lea.vmem [#allocation9], %s324_s28  ;;  %v202_v0 = vld [vmem:[%s175_s6] sm:$0xff]  ;;  %v203_v1 = vld [vmem:[#allocation7] sm:$0xff] }
  0x24   : > { %s219_s8 = scalar_lea.hbm %s725_s3, %s328_s26  ;;  %s221_s11 = sshll.u32 %s201_s10, 4  ;;  %vm205_vm0 = vcmask 261120   ;;  %v204_v2 = vadd.f32 %v203_v1, %v202_v0  ;;  %s222_s11 = int_to_ptr.vmem [resolvable:$true] %s221_s11 }
  0x25   : > { %s223_s17 = sshll.u32 %s219_s8, 4  ;;  %s208_s19 = scalar_lea.sflag [#allocation6], %s672_s27  ;;  %s224_s17 = int_to_ptr.hbm [resolvable:$true] %s223_s17 }
  0x26   : > { %206 = vst.msk [vmem:[%s201_s10] sm:$0xff] %vm205_vm0, %v204_v2  ;;  %s478_s21 = sshra.s32 %s224_s17, 4  ;;  %s484_s24 = scalar_lea.hbm %s725_s3, 16  ;;  %s479_s21 = int_to_ptr.hbm [resolvable:$true] %s478_s21 }
  0x27   : > { %s480_s18 = scalar_lea.hbm %s479_s21, 8  ;;  %p485_p11 = scmp.lt.s32.totalorder %s479_s21, %s725_s3 }
  0x28   : > { %p481_p1 = scmp.ne.s32.totalorder %s479_s21, %s480_s18  ;;  %p486_p12 = scmp.lt.s32.totalorder %s484_s24, %s480_s18 }
  0x2a   : > { %p482_p4 = pnand %p481_p1, %p652_p5  ;;  %p487_p13 = por %p486_p12, %p485_p11 }
  0x2c   : > { %p483_p8 = pneg %p482_p4 }
  0x2e   : > { %p488_p0 = pnand %p487_p13, %p483_p8 }
  0x30   : > { %491 = shalt.err (!%p488_p0)
}
  0x31   : > { %337 = dma.vmem_to_hbm [thread:$0]  (%p652_p5), %s222_s11, 128, %s224_s17, %s208_s19  }
  0x32 PF: > { %s235_s27 = sand.u32 1, %s530_s12   ;;  %p348_p3 = pnand %p320_p9, %p622_p6 }
  0x33   : > { %s236_s28 = scalar_lea.sflag [#allocation6], %s235_s27 }
  0x34   : > { %p349_p7 = pneg %p348_p3 }
  0x36   : > { %525 = dma.done.wait (%p349_p7), %s236_s28, 128  }
  0x37   : > { %527 = vsyncadd (%p349_p7), %s236_s28, 4294967168  ;;  %s21_s16 = sadd.s32 1, %s550_s16   ;;  %s733_s12 = smov %s534_s13 }
  0x38   : > { %p18_p10 = scmp.ge.s32.totalorder %s21_s16, 4   ;;  %s734_s13 = smov %s538_s14 }
  0x39   : > { %s735_s14 = smov %s661_s9  ;;  %s736_s0 = smov %s546_s15 }
  0x3a   : > { %s737_s15 = smov %s739_s29  ;;  %20 = sbr.rel (!%p18_p10) target bundleno = 7 (0x7), region = 78 }
  0x3f   :  { %242 = vsyncpa [#allocation5], 1 }
  0x40   :  { %244 = vsyncpa [#allocation5 + $0x1], 1 }
  0x41   :  { %245 = vsyncpa [#allocation8], 1 }
  0x42   :  { %246 = vsyncpa [#allocation6], 1 }
  0x43   :  { %248 = vsyncpa [#allocation6 + $0x1], 1 }

</bundles_post_ra>
